<compile_context>
chip_gen: v6e
topology: v6e:2x2x1
jax: 0.10.0
libtpu: 0.0.40
codegen_flags: <defaults>
</compile_context>

<pallas_src>
import functools

import jax
import jax.numpy as jnp
from jax import lax
from jax.experimental import pallas as pl
from jax.experimental.pallas import tpu as pltpu

BN_EPS = 1e-5            # nn.BatchNorm2d default
SPP_KS = (5, 9, 13)      # SPPCSPC max-pool kernel sizes
SPP_PAD = max(SPP_KS) // 2   # 6


def _round_up(a, b):
    return -(-a // b) * b


# ----------------------------------------------------------------------------
# K1: fused cv1 + cv2 (1x1 conv + BN + SiLU, shared input read, two outputs)
# ----------------------------------------------------------------------------
def _cv12_kernel(x_ref, w_ref, s_ref, b_ref, o1_ref, o2_ref):
    # x_ref: (TM, C1)   w_ref: (2, C1, c_)   s_ref/b_ref: (2, 1, c_)
    x = x_ref[...]
    for j, o_ref in enumerate((o1_ref, o2_ref)):
        y = jnp.dot(x, w_ref[j], preferred_element_type=jnp.float32)
        y = y * s_ref[j] + b_ref[j]
        o_ref[...] = (y * jax.nn.sigmoid(y)).astype(o_ref.dtype)     # SiLU


def conv1x1_dual(x2d, w2, s2, b2):
    """x2d: (M, C1) -> (cv1(x): (M, c_), cv2(x): (M, c_)) in one pass over x."""
    M, C1 = x2d.shape
    c_ = w2.shape[-1]
    # Large-ish row tiles, >=2 grid steps when possible; pad M instead of TM=M fallback.
    tm = 512 if M >= 4096 else max(8, _round_up(-(-M // 2), 8))
    Mp = _round_up(M, tm)
    if Mp != M:
        x2d = jnp.pad(x2d, ((0, Mp - M), (0, 0)))
    a, y2 = pl.pallas_call(
        _cv12_kernel,
        out_shape=(jax.ShapeDtypeStruct((Mp, c_), x2d.dtype),
                   jax.ShapeDtypeStruct((Mp, c_), x2d.dtype)),
        grid_spec=pltpu.PrefetchScalarGridSpec(
            num_scalar_prefetch=0,
            grid=(Mp // tm,),
            in_specs=[
                pl.BlockSpec((tm, C1), lambda i: (i, 0)),
                pl.BlockSpec((2, C1, c_), lambda i: (0, 0, 0)),
                pl.BlockSpec((2, 1, c_), lambda i: (0, 0, 0)),
                pl.BlockSpec((2, 1, c_), lambda i: (0, 0, 0)),
            ],
            out_specs=[pl.BlockSpec((tm, c_), lambda i: (i, 0)),
                       pl.BlockSpec((tm, c_), lambda i: (i, 0))],
        ),
        compiler_params=pltpu.CompilerParams(dimension_semantics=("parallel",)),
    )(x2d, w2, s2, b2)
    return a[:M], y2[:M]


# ----------------------------------------------------------------------------
# K2: cv3 (3x3) + cv4 (1x1), per-batch.  dx folded into channels -> only
#     leading-(row-)axis ref slices inside the kernel; 3 matmuls with K=3*Cin.
# ----------------------------------------------------------------------------
def _conv3x3_1x1_kernel(xcol_ref, w3_ref, s3_ref, b3_ref,
                        w4_ref, s4_ref, b4_ref, o_ref, *, H, W):
    # xcol_ref: (H+2, W, 3*Cin)   w3_ref: (3, 3*Cin, Cm)   w4_ref: (Cm, Cm)
    K3 = w3_ref.shape[1]
    Cm = w3_ref.shape[2]
    acc = jnp.zeros((H * W, Cm), jnp.float32)
    for dy in range(3):
        patch = xcol_ref[dy:dy + H].reshape(H * W, K3)   # leading-axis slice (free view)
        acc = acc + jnp.dot(patch, w3_ref[dy], preferred_element_type=jnp.float32)
    y = acc * s3_ref[...] + b3_ref[...]
    y = y * jax.nn.sigmoid(y)                            # cv3 output stays in VMEM (f32)
    z = jnp.dot(y, w4_ref[...], preferred_element_type=jnp.float32)
    z = z * s4_ref[...] + b4_ref[...]
    o_ref[...] = (z * jax.nn.sigmoid(z)).astype(o_ref.dtype)


def conv3x3_then_1x1(xcol, w3r, s3, b3, w4, s4, b4):
    N, Hp2, W, K3 = xcol.shape
    H = Hp2 - 2
    Cm = w3r.shape[-1]
    kernel = functools.partial(_conv3x3_1x1_kernel, H=H, W=W)
    return pl.pallas_call(
        kernel,
        out_shape=jax.ShapeDtypeStruct((N, H * W, Cm), xcol.dtype),
        grid_spec=pltpu.PrefetchScalarGridSpec(
            num_scalar_prefetch=0,
            grid=(N,),
            in_specs=[
                pl.BlockSpec((pl.Squeezed(), Hp2, W, K3), lambda b: (b, 0, 0, 0)),
                pl.BlockSpec((3, K3, Cm), lambda b: (0, 0, 0)),
                pl.BlockSpec((1, Cm), lambda b: (0, 0)),
                pl.BlockSpec((1, Cm), lambda b: (0, 0)),
                pl.BlockSpec((Cm, Cm), lambda b: (0, 0)),
                pl.BlockSpec((1, Cm), lambda b: (0, 0)),
                pl.BlockSpec((1, Cm), lambda b: (0, 0)),
            ],
            out_specs=pl.BlockSpec((pl.Squeezed(), H * W, Cm), lambda b: (b, 0, 0)),
        ),
        compiler_params=pltpu.CompilerParams(dimension_semantics=("parallel",)),
    )(xcol, w3r, s3, b3, w4, s4, b4)


# ----------------------------------------------------------------------------
# K3: SPP max-pools (5/9/13, stride 1, SAME, -inf pad) + cv5 (split-K 1x1),
#     per-batch.  Cascaded separable max:
#       p5  = separable 5x5 pool on an extended window (centers [-4, H+3] x [-4, W+3])
#       p9  = max of p5 at the four (+-2, +-2) offsets  (exactly the 9x9 pool)
#       p13 = max of p9 at the four (+-2, +-2) offsets  (exactly the 13x13 pool)
#     14 max ops instead of 48; the 4*c_ concat is never materialized in HBM and the
#     identity branch is sliced from the same padded tile (no separate x1 stream).
# ----------------------------------------------------------------------------
def _spp_cv5_kernel(xp_ref, w5_ref, s5_ref, b5_ref, o_ref, *, H, W):
    # xp_ref: (H+12, W+12, c_) padded with -inf (6 rows/cols each side)
    Cm = xp_ref.shape[-1]

    # Identity branch: the un-pooled x1 is the center window of the padded tile.
    x1 = xp_ref[SPP_PAD:SPP_PAD + H][:, SPP_PAD:SPP_PAD + W, :].reshape(H * W, Cm)
    acc = jnp.dot(x1, w5_ref[0], preferred_element_type=jnp.float32)

    # p5: rows via leading-axis ref slices (free views) ...
    rm = xp_ref[0:H + 8]
    for dy in range(1, 5):
        rm = jnp.maximum(rm, xp_ref[dy:dy + H + 8])                # (H+8, W+12, Cm)
    # ... then columns on the value.
    p5 = rm[:, 0:W + 8]
    for dx in range(1, 5):
        p5 = jnp.maximum(p5, rm[:, dx:dx + W + 8])                 # (H+8, W+8), centers [-4, H+3]

    # p9 / p13 via corner-shift cascade (union of four shifted boxes = larger box).
    p9 = jnp.maximum(jnp.maximum(p5[0:H + 4, 0:W + 4], p5[0:H + 4, 4:W + 8]),
                     jnp.maximum(p5[4:H + 8, 0:W + 4], p5[4:H + 8, 4:W + 8]))   # centers [-2, H+1]
    p13 = jnp.maximum(jnp.maximum(p9[0:H, 0:W], p9[0:H, 4:W + 4]),
                      jnp.maximum(p9[4:H + 4, 0:W], p9[4:H + 4, 4:W + 4]))      # centers [0, H-1]

    acc = acc + jnp.dot(p5[4:H + 4, 4:W + 4].reshape(H * W, Cm), w5_ref[1],
                        preferred_element_type=jnp.float32)
    acc = acc + jnp.dot(p9[2:H + 2, 2:W + 2].reshape(H * W, Cm), w5_ref[2],
                        preferred_element_type=jnp.float32)
    acc = acc + jnp.dot(p13.reshape(H * W, Cm), w5_ref[3],
                        preferred_element_type=jnp.float32)

    y = acc * s5_ref[...] + b5_ref[...]
    o_ref[...] = (y * jax.nn.sigmoid(y)).astype(o_ref.dtype)


def spp_then_1x1(x1_pad, w5r, s5, b5, *, H, W):
    N, Hp, Wp, Cm = x1_pad.shape
    Cout = w5r.shape[-1]
    kernel = functools.partial(_spp_cv5_kernel, H=H, W=W)
    return pl.pallas_call(
        kernel,
        out_shape=jax.ShapeDtypeStruct((N, H * W, Cout), x1_pad.dtype),
        grid_spec=pltpu.PrefetchScalarGridSpec(
            num_scalar_prefetch=0,
            grid=(N,),
            in_specs=[
                pl.BlockSpec((pl.Squeezed(), Hp, Wp, Cm), lambda b: (b, 0, 0, 0)),
                pl.BlockSpec((4, Cm, Cout), lambda b: (0, 0, 0)),
                pl.BlockSpec((1, Cout), lambda b: (0, 0)),
                pl.BlockSpec((1, Cout), lambda b: (0, 0)),
            ],
            out_specs=pl.BlockSpec((pl.Squeezed(), H * W, Cout), lambda b: (b, 0, 0)),
        ),
        compiler_params=pltpu.CompilerParams(dimension_semantics=("parallel",)),
    )(x1_pad, w5r, s5, b5)


# ----------------------------------------------------------------------------
# K4: cv6 (3x3) + cv7 (split-K 1x1 over [y1, y2]), per-batch.
#     The final 2*c_ concat is never materialized in HBM.
# ----------------------------------------------------------------------------
def _cv67_kernel(ccol_ref, w6_ref, s6_ref, b6_ref,
                 y2_ref, w7_ref, s7_ref, b7_ref, o_ref, *, H, W):
    K3 = w6_ref.shape[1]
    Cm = w6_ref.shape[2]
    acc = jnp.zeros((H * W, Cm), jnp.float32)
    for dy in range(3):
        patch = ccol_ref[dy:dy + H].reshape(H * W, K3)
        acc = acc + jnp.dot(patch, w6_ref[dy], preferred_element_type=jnp.float32)
    y1 = acc * s6_ref[...] + b6_ref[...]
    y1 = y1 * jax.nn.sigmoid(y1)                         # cv6 output stays in VMEM (f32)
    z = jnp.dot(y1, w7_ref[0], preferred_element_type=jnp.float32)
    z = z + jnp.dot(y2_ref[...], w7_ref[1], preferred_element_type=jnp.float32)
    z = z * s7_ref[...] + b7_ref[...]
    o_ref[...] = (z * jax.nn.sigmoid(z)).astype(o_ref.dtype)


def conv3x3_then_split1x1(ccol, w6r, s6, b6, y2, w7r, s7, b7):
    N, Hp2, W, K3 = ccol.shape
    H = Hp2 - 2
    Cm = w6r.shape[-1]
    C2 = w7r.shape[-1]
    kernel = functools.partial(_cv67_kernel, H=H, W=W)
    return pl.pallas_call(
        kernel,
        out_shape=jax.ShapeDtypeStruct((N, H * W, C2), ccol.dtype),
        grid_spec=pltpu.PrefetchScalarGridSpec(
            num_scalar_prefetch=0,
            grid=(N,),
            in_specs=[
                pl.BlockSpec((pl.Squeezed(), Hp2, W, K3), lambda b: (b, 0, 0, 0)),
                pl.BlockSpec((3, K3, Cm), lambda b: (0, 0, 0)),
                pl.BlockSpec((1, Cm), lambda b: (0, 0)),
                pl.BlockSpec((1, Cm), lambda b: (0, 0)),
                pl.BlockSpec((pl.Squeezed(), H * W, Cm), lambda b: (b, 0, 0)),
                pl.BlockSpec((2, Cm, C2), lambda b: (0, 0, 0)),
                pl.BlockSpec((1, C2), lambda b: (0, 0)),
                pl.BlockSpec((1, C2), lambda b: (0, 0)),
            ],
            out_specs=pl.BlockSpec((pl.Squeezed(), H * W, C2), lambda b: (b, 0, 0)),
        ),
        compiler_params=pltpu.CompilerParams(dimension_semantics=("parallel",)),
    )(ccol, w6r, s6, b6, y2, w7r, s7, b7)


# ----------------------------------------------------------------------------
# Parameter construction (deterministic, synthetic) + BN folding
# ----------------------------------------------------------------------------
def make_conv_params(key, cin, cout, k):
    kw, kg, kb, km, kv = jax.random.split(key, 5)
    w = jax.random.normal(kw, (k, k, cin, cout), jnp.float32) * 0.1   # HWIO
    gamma = 1.0 + 0.1 * jax.random.normal(kg, (cout,), jnp.float32)
    beta = 0.1 * jax.random.normal(kb, (cout,), jnp.float32)
    mean = 0.1 * jax.random.normal(km, (cout,), jnp.float32)
    var = jax.random.uniform(kv, (cout,), jnp.float32, 0.5, 1.5)
    scale = gamma / jnp.sqrt(var + BN_EPS)
    bias = beta - mean * scale
    return {"w": w, "scale": scale.reshape(1, cout), "bias": bias.reshape(1, cout)}


def make_sppcspc_params(key, c1, c2, e=0.5):
    c_ = int(2 * c2 * e)
    ks = jax.random.split(key, 7)
    params = {
        "cv1": make_conv_params(ks[0], c1, c_, 1),
        "cv2": make_conv_params(ks[1], c1, c_, 1),
        "cv3": make_conv_params(ks[2], c_, c_, 3),
        "cv4": make_conv_params(ks[3], c_, c_, 1),
        "cv5": make_conv_params(ks[4], 4 * c_, c_, 1),
        "cv6": make_conv_params(ks[5], c_, c_, 3),
        "cv7": make_conv_params(ks[6], 2 * c_, c2, 1),
    }
    return params, c_


# ----------------------------------------------------------------------------
# SPPCSPC forward (Pallas hot path, thin JAX glue)
# ----------------------------------------------------------------------------
def _im2col_dx(x_nhwc):
    """Zero-pad for a 3x3 SAME conv and fold the dx taps into the channel axis:
    (N, H, W, C) -> (N, H+2, W, 3*C).  Kernels then only slice the row axis."""
    N, H, W, C = x_nhwc.shape
    xp = jnp.pad(x_nhwc, ((0, 0), (1, 1), (1, 1), (0, 0)))
    return jnp.concatenate([xp[:, :, dx:dx + W, :] for dx in range(3)], axis=-1)


def sppcspc_forward(x_nchw, params, c_, c2):
    x = jnp.transpose(x_nchw, (0, 2, 3, 1))              # NCHW -> NHWC
    N, H, W, C1 = x.shape
    x2d = x.reshape(N * H * W, C1)

    # K1: fused cv1 + cv2 (one HBM read of x)
    w12 = jnp.stack([params["cv1"]["w"].reshape(C1, c_),
                     params["cv2"]["w"].reshape(C1, c_)])
    s12 = jnp.stack([params["cv1"]["scale"], params["cv2"]["scale"]])
    b12 = jnp.stack([params["cv1"]["bias"], params["cv2"]["bias"]])
    a2d, y2_2d = conv1x1_dual(x2d, w12, s12, b12)

    # K2: cv3 (3x3) + cv4 (1x1)
    acol = _im2col_dx(a2d.reshape(N, H, W, c_))
    w3r = params["cv3"]["w"].reshape(3, 3 * c_, c_)
    x1 = conv3x3_then_1x1(acol, w3r, params["cv3"]["scale"], params["cv3"]["bias"],
                          params["cv4"]["w"].reshape(c_, c_),
                          params["cv4"]["scale"], params["cv4"]["bias"])

    # K3: SPP max-pools + cv5 (split-K, concat never materialized)
    x1_pad = jnp.pad(x1.reshape(N, H, W, c_),
                     ((0, 0), (SPP_PAD, SPP_PAD), (SPP_PAD, SPP_PAD), (0, 0)),
                     constant_values=-jnp.inf)
    w5r = params["cv5"]["w"].reshape(4, c_, c_)          # [identity, pool5, pool9, pool13]
    c5 = spp_then_1x1(x1_pad, w5r,
                      params["cv5"]["scale"], params["cv5"]["bias"], H=H, W=W)

    # K4: cv6 (3x3) + cv7 (split-K over [y1, y2], concat never materialized)
    ccol = _im2col_dx(c5.reshape(N, H, W, c_))
    w6r = params["cv6"]["w"].reshape(3, 3 * c_, c_)
    w7r = params["cv7"]["w"].reshape(2, c_, c2)          # [y1, y2]
    out = conv3x3_then_split1x1(ccol, w6r, params["cv6"]["scale"], params["cv6"]["bias"],
                                y2_2d.reshape(N, H * W, c_), w7r,
                                params["cv7"]["scale"], params["cv7"]["bias"])

    return jnp.transpose(out.reshape(N, H, W, c2), (0, 3, 1, 2))   # back to NCHW


# ----------------------------------------------------------------------------
# Pure-JAX reference for verification
# ----------------------------------------------------------------------------
def _ref_conv(x_nhwc, p):
    y = lax.conv_general_dilated(x_nhwc, p["w"], (1, 1), "SAME",
                                 dimension_numbers=("NHWC", "HWIO", "NHWC"))
    y = y * p["scale"].reshape(-1) + p["bias"].reshape(-1)
    return y * jax.nn.sigmoid(y)


def _ref_maxpool(x_nhwc, k):
    pad = k // 2
    return lax.reduce_window(x_nhwc, -jnp.inf, lax.max, (1, k, k, 1), (1, 1, 1, 1),
                             [(0, 0), (pad, pad), (pad, pad), (0, 0)])


def sppcspc_reference(x_nchw, params):
    x = jnp.transpose(x_nchw, (0, 2, 3, 1))
    x1 = _ref_conv(_ref_conv(_ref_conv(x, params["cv1"]), params["cv3"]), params["cv4"])
    cat1 = jnp.concatenate([x1] + [_ref_maxpool(x1, k) for k in SPP_KS], axis=-1)
    y1 = _ref_conv(_ref_conv(cat1, params["cv5"]), params["cv6"])
    y2 = _ref_conv(x, params["cv2"])
    out = _ref_conv(jnp.concatenate([y1, y2], axis=-1), params["cv7"])
    return jnp.transpose(out, (0, 3, 1, 2))


# ----------------------------------------------------------------------------
if __name__ == "__main__":
    key = jax.random.PRNGKey(0)
    kx, kp = jax.random.split(key)

    N, C1, H, W = 2, 4, 16, 16
    C2 = 4

    x = jax.random.normal(kx, (N, C1, H, W), jnp.float32)
    params, c_ = make_sppcspc_params(kp, C1, C2, e=0.5)

    out = jax.block_until_ready(sppcspc_forward(x, params, c_, C2))
    ref = jax.block_until_ready(sppcspc_reference(x, params))

    assert out.shape == (N, C2, H, W), out.shape
    max_err = float(jnp.max(jnp.abs(out - ref)))
    assert jnp.allclose(out, ref, atol=1e-3, rtol=1e-3), max_err

    print("KERNEL_OK")
</pallas_src>

<mosaic_0001>
module attributes {stable_mosaic.version = 11 : i64} {
  func.func @_cv12_kernel(%arg0: i32, %arg1: memref<256x4xf32, #tpu.memory_space<vmem>>, %arg2: memref<2x4x4xf32, #tpu.memory_space<vmem>>, %arg3: memref<2x1x4xf32, #tpu.memory_space<vmem>>, %arg4: memref<2x1x4xf32, #tpu.memory_space<vmem>>, %arg5: memref<256x4xf32, #tpu.memory_space<vmem>>, %arg6: memref<256x4xf32, #tpu.memory_space<vmem>>) attributes {dimension_semantics = [#tpu.dimension_semantics<parallel>], iteration_bounds = array<i64: 2>, scalar_prefetch = 0 : i64, scratch_operands = 0 : i64, tpu.core_type = #tpu.core_type<tc>, window_params = [{transform_indices = @transform_0, window_bounds = array<i64: 256, 4>}, {pipeline_mode = #tpu.pipeline_mode<synchronous>, transform_indices = @transform_1, window_bounds = array<i64: 2, 4, 4>}, {pipeline_mode = #tpu.pipeline_mode<synchronous>, transform_indices = @transform_2, window_bounds = array<i64: 2, 1, 4>}, {pipeline_mode = #tpu.pipeline_mode<synchronous>, transform_indices = @transform_3, window_bounds = array<i64: 2, 1, 4>}, {transform_indices = @transform_4, window_bounds = array<i64: 256, 4>}, {transform_indices = @transform_5, window_bounds = array<i64: 256, 4>}]} {
    %c0 = arith.constant 0 : index
    %c0_0 = arith.constant 0 : index
    %0 = vector.load %arg1[%c0, %c0_0] : memref<256x4xf32, #tpu.memory_space<vmem>>, vector<256x4xf32>
    %c0_1 = arith.constant 0 : index
    %c0_2 = arith.constant 0 : index
    %c0_3 = arith.constant 0 : index
    %1 = vector.load %arg2[%c0_1, %c0_2, %c0_3] : memref<2x4x4xf32, #tpu.memory_space<vmem>>, vector<1x4x4xf32>
    %2 = vector.shape_cast %1 : vector<1x4x4xf32> to vector<4x4xf32>
    %cst = arith.constant dense<0.000000e+00> : vector<256x4xf32>
    %3 = tpu.matmul %0, %2, %cst {dimension_numbers = #tpu.dot_dimension_numbers<[1], [0], [0], [1], [0, 0, 1, 1], [], []>} : vector<256x4xf32>, vector<4x4xf32>, vector<256x4xf32> -> vector<256x4xf32>
    %c0_4 = arith.constant 0 : index
    %c0_5 = arith.constant 0 : index
    %c0_6 = arith.constant 0 : index
    %4 = vector.load %arg3[%c0_4, %c0_5, %c0_6] : memref<2x1x4xf32, #tpu.memory_space<vmem>>, vector<1x1x4xf32>
    %5 = vector.shape_cast %4 : vector<1x1x4xf32> to vector<1x4xf32>
    %6 = vector.broadcast %5 : vector<1x4xf32> to vector<256x4xf32>
    %7 = arith.mulf %3, %6 : vector<256x4xf32>
    %c0_7 = arith.constant 0 : index
    %c0_8 = arith.constant 0 : index
    %c0_9 = arith.constant 0 : index
    %8 = vector.load %arg4[%c0_7, %c0_8, %c0_9] : memref<2x1x4xf32, #tpu.memory_space<vmem>>, vector<1x1x4xf32>
    %9 = vector.shape_cast %8 : vector<1x1x4xf32> to vector<1x4xf32>
    %10 = vector.broadcast %9 : vector<1x4xf32> to vector<256x4xf32>
    %11 = arith.addf %7, %10 : vector<256x4xf32>
    %12 = arith.negf %11 : vector<256x4xf32>
    %13 = math.exp %12 : vector<256x4xf32>
    %cst_10 = arith.constant 1.000000e+00 : f32
    %14 = vector.broadcast %cst_10 : f32 to vector<256x4xf32>
    %15 = arith.addf %14, %13 : vector<256x4xf32>
    %16 = arith.divf %14, %15 : vector<256x4xf32>
    %17 = arith.mulf %11, %16 : vector<256x4xf32>
    %c0_11 = arith.constant 0 : index
    %c0_12 = arith.constant 0 : index
    %18 = vector.load %arg5[%c0_11, %c0_12] : memref<256x4xf32, #tpu.memory_space<vmem>>, vector<256x4xf32>
    tpu.vector_store %arg5[%c0_11, %c0_12], %17 {strides = array<i32>} : memref<256x4xf32, #tpu.memory_space<vmem>>, vector<256x4xf32>,
    %c1 = arith.constant 1 : index
    %c0_13 = arith.constant 0 : index
    %c0_14 = arith.constant 0 : index
    %19 = vector.load %arg2[%c1, %c0_13, %c0_14] : memref<2x4x4xf32, #tpu.memory_space<vmem>>, vector<1x4x4xf32>
    %20 = vector.shape_cast %19 : vector<1x4x4xf32> to vector<4x4xf32>
    %cst_15 = arith.constant dense<0.000000e+00> : vector<256x4xf32>
    %21 = tpu.matmul %0, %20, %cst_15 {dimension_numbers = #tpu.dot_dimension_numbers<[1], [0], [0], [1], [0, 0, 1, 1], [], []>} : vector<256x4xf32>, vector<4x4xf32>, vector<256x4xf32> -> vector<256x4xf32>
    %c1_16 = arith.constant 1 : index
    %c0_17 = arith.constant 0 : index
    %c0_18 = arith.constant 0 : index
    %22 = vector.load %arg3[%c1_16, %c0_17, %c0_18] : memref<2x1x4xf32, #tpu.memory_space<vmem>>, vector<1x1x4xf32>
    %23 = vector.shape_cast %22 : vector<1x1x4xf32> to vector<1x4xf32>
    %24 = vector.broadcast %23 : vector<1x4xf32> to vector<256x4xf32>
    %25 = arith.mulf %21, %24 : vector<256x4xf32>
    %c1_19 = arith.constant 1 : index
    %c0_20 = arith.constant 0 : index
    %c0_21 = arith.constant 0 : index
    %26 = vector.load %arg4[%c1_19, %c0_20, %c0_21] : memref<2x1x4xf32, #tpu.memory_space<vmem>>, vector<1x1x4xf32>
    %27 = vector.shape_cast %26 : vector<1x1x4xf32> to vector<1x4xf32>
    %28 = vector.broadcast %27 : vector<1x4xf32> to vector<256x4xf32>
    %29 = arith.addf %25, %28 : vector<256x4xf32>
    %30 = arith.negf %29 : vector<256x4xf32>
    %31 = math.exp %30 : vector<256x4xf32>
    %cst_22 = arith.constant 1.000000e+00 : f32
    %32 = vector.broadcast %cst_22 : f32 to vector<256x4xf32>
    %33 = arith.addf %32, %31 : vector<256x4xf32>
    %34 = arith.divf %32, %33 : vector<256x4xf32>
    %35 = arith.mulf %29, %34 : vector<256x4xf32>
    %c0_23 = arith.constant 0 : index
    %c0_24 = arith.constant 0 : index
    %36 = vector.load %arg6[%c0_23, %c0_24] : memref<256x4xf32, #tpu.memory_space<vmem>>, vector<256x4xf32>
    tpu.vector_store %arg6[%c0_23, %c0_24], %35 {strides = array<i32>} : memref<256x4xf32, #tpu.memory_space<vmem>>, vector<256x4xf32>,
    return
  }
  func.func @transform_0(%arg0: i32) -> (i32, i32) {
    %c0_i32 = arith.constant 0 : i32
    %c0_i32_0 = arith.constant 0 : i32
    return %arg0, %c0_i32 : i32, i32
  }
  func.func @transform_1(%arg0: i32) -> (i32, i32, i32) {
    %c0_i32 = arith.constant 0 : i32
    %c0_i32_0 = arith.constant 0 : i32
    %c0_i32_1 = arith.constant 0 : i32
    %c0_i32_2 = arith.constant 0 : i32
    return %c0_i32, %c0_i32_0, %c0_i32_1 : i32, i32, i32
  }
  func.func @transform_2(%arg0: i32) -> (i32, i32, i32) {
    %c0_i32 = arith.constant 0 : i32
    %c0_i32_0 = arith.constant 0 : i32
    %c0_i32_1 = arith.constant 0 : i32
    %c0_i32_2 = arith.constant 0 : i32
    return %c0_i32, %c0_i32_0, %c0_i32_1 : i32, i32, i32
  }
  func.func @transform_3(%arg0: i32) -> (i32, i32, i32) {
    %c0_i32 = arith.constant 0 : i32
    %c0_i32_0 = arith.constant 0 : i32
    %c0_i32_1 = arith.constant 0 : i32
    %c0_i32_2 = arith.constant 0 : i32
    return %c0_i32, %c0_i32_0, %c0_i32_1 : i32, i32, i32
  }
  func.func @transform_4(%arg0: i32) -> (i32, i32) {
    %c0_i32 = arith.constant 0 : i32
    %c0_i32_0 = arith.constant 0 : i32
    return %arg0, %c0_i32 : i32, i32
  }
  func.func @transform_5(%arg0: i32) -> (i32, i32) {
    %c0_i32 = arith.constant 0 : i32
    %c0_i32_0 = arith.constant 0 : i32
    return %arg0, %c0_i32 : i32, i32
  }
}

</mosaic_0001>

<bundles_post_ra>
// kernel: tpu_custom_call.1
= control target key start
LH: loop header
LB: loop body
LE: loop exit
PB: predicated region body
PF: predicated region fallthrough
CT: control target
= control target key end

     0   :  { %s2213_s18 = smov 0   ;;  %s2892_s0 = inlined_call_operand.vmem [shape: f32[512,4], index: 0, kind: input, shape index: {}]   ;;  %s2893_s1 = inlined_call_operand.vmem [shape: f32[2,4,4], index: 1, kind: input, shape index: {}]   ;;  %s2894_s2 = inlined_call_operand.vmem [shape: f32[2,1,4], index: 2, kind: input, shape index: {}]   ;;  %s2895_s3 = inlined_call_operand.vmem [shape: f32[2,1,4], index: 3, kind: input, shape index: {}]   ;;  %s2896_s4 = inlined_call_operand.vmem [shape: f32[512,4], index: 4, kind: output, shape index: {0}]   ;;  %s2897_s5 = inlined_call_operand.vmem [shape: f32[512,4], index: 5, kind: output, shape index: {1}]  }
   0x1 LB: > { %s1591_s19 = sadd.s32 4294967295, %s2181_s18   ;;  %p1595_p0 = scmp.ge.s32.totalorder %s2181_s18, 1  ;;  %s2181_s18 = sphi %s2213_s18, %s16_s18  }
   0x2   : > { %p191_p1 = scmp.lt.s32.totalorder %s2181_s18, 3 }
   0x4   : > { %p192_p2 = pnand %p1595_p0, %p191_p1 }
   0x5   : > { %s1596_s24 = sshll.u32 (!%p192_p2), %s1591_s19, 5 }
   0x6   : > { %195 = sbr.rel (%p192_p2) target bundleno = 364 (0x16c), region = 36  ;;  %p225_p3 = scmp.lt.s32.totalorder (!%p192_p2), %s1596_s24, 63 }
   0xb   : > { %v274_v0 = vld [vmem:[%s2893_s1] sm:$0xf]  ;;  %vm372_vm0 = vcmask 1043456   ;;  %v1669_v1 = vld [vmem:[%s2893_s1 + $0x4] sm:$0xf]  ;;  %s2899_s24 = smov (!%p225_p3, %s1596_s24), 63 }
   0xc   : > { %1807 = vmatprep.subr.msk.mxu0 %vm372_vm0, %v274_v0  ;;  %1857 = vmatprep.subr.msk.mxu1 %vm372_vm0, %v1669_v1  ;;  %s2227_s25 = sshll.u32 %s2899_s24, 3  ;;  %vm275_vm1 = vcmask 31744   ;;  %v2334_v34 = vld [vmem:[%s2894_s2] ss:$0 sm:$0xff]  ;;  %v2339_v35 = vld [vmem:[%s2894_s2 + $0x1] ss:$0 sm:$0xff] }
   0xd   : > { %1808 = vmatpush3.msk.msra.mxu0 %vm372_vm0, %v274_v0  ;;  %1858 = vmatpush3.msk.msra.mxu1 %vm372_vm0, %v1669_v1  ;;  %s2233_s28 = scalar_lea.vmem %s2892_s0, %s2227_s25  ;;  %v2344_v37 = vld [vmem:[%s2895_s3] ss:$0 sm:$0xff]  ;;  %v2349_v39 = vld [vmem:[%s2895_s3 + $0x1] ss:$0 sm:$0xff]  ;;  %s2468_s14 = scalar_lea.vmem %s2896_s4, %s2227_s25 }
   0xe   : > { %v242_v2 = vld [vmem:[%s2233_s28] sm:$0xff]  ;;  %v243_v3 = vld [vmem:[%s2233_s28 + $0x8] sm:$0xff]  ;;  %v244_v4 = vld [vmem:[%s2233_s28 + $0x10] sm:$0xff]  ;;  %s2477_s17 = scalar_lea.vmem %s2897_s5, %s2227_s25 }
   0xf   : > { %1809 = vmatprep.mubr.msk.f32.mxu0 %vm275_vm1, %v242_v2  ;;  %1859 = vmatprep.mubr.msk.f32.mxu1 %vm275_vm1, %v242_v2  ;;  %v245_v5 = vld [vmem:[%s2233_s28 + $0x18] sm:$0xff]  ;;  %v246_v6 = vld [vmem:[%s2233_s28 + $0x20] sm:$0xff]  ;;  %v247_v7 = vld [vmem:[%s2233_s28 + $0x28] sm:$0xff] }
  0x10   : > { %1810 = vmatmul.mubr.msk.f32.vlgmr.msra.gmra.mxu0 %vm275_vm1, %v243_v3  ;;  %1860 = vmatmul.mubr.msk.f32.vlgmr.msra.gmra.mxu1 %vm275_vm1, %v243_v3  ;;  %v248_v8 = vld [vmem:[%s2233_s28 + $0x30] sm:$0xff]  ;;  %v249_v9 = vld [vmem:[%s2233_s28 + $0x38] sm:$0xff]  ;;  %v250_v10 = vld [vmem:[%s2233_s28 + $0x40] sm:$0xff] }
  0x11   : > { %1812 = vmatprep.mubr.msk.f32.mxu0 %vm275_vm1, %v244_v4  ;;  %1862 = vmatprep.mubr.msk.f32.mxu1 %vm275_vm1, %v244_v4  ;;  %v251_v11 = vld [vmem:[%s2233_s28 + $0x48] sm:$0xff]  ;;  %v252_v12 = vld [vmem:[%s2233_s28 + $0x50] sm:$0xff]  ;;  %v253_v13 = vld [vmem:[%s2233_s28 + $0x58] sm:$0xff] }
  0x12   : > { %v254_v14 = vld [vmem:[%s2233_s28 + $0x60] sm:$0xff]  ;;  %v255_v15 = vld [vmem:[%s2233_s28 + $0x68] sm:$0xff]  ;;  %v256_v16 = vld [vmem:[%s2233_s28 + $0x70] sm:$0xff] }
  0x13   : > { %v257_v17 = vld [vmem:[%s2233_s28 + $0x78] sm:$0xff]  ;;  %v258_v18 = vld [vmem:[%s2233_s28 + $0x80] sm:$0xff]  ;;  %v259_v19 = vld [vmem:[%s2233_s28 + $0x88] sm:$0xff] }
  0x14   : > { %1813 = vmatmul.mubr.msk.f32.gmra.mxu0 %vm275_vm1, %v245_v5  ;;  %1863 = vmatmul.mubr.msk.f32.gmra.mxu1 %vm275_vm1, %v245_v5  ;;  %v260_v20 = vld [vmem:[%s2233_s28 + $0x90] sm:$0xff]  ;;  %v261_v21 = vld [vmem:[%s2233_s28 + $0x98] sm:$0xff]  ;;  %v262_v22 = vld [vmem:[%s2233_s28 + $0xa0] sm:$0xff] }
  0x15   : > { %1815 = vmatprep.mubr.msk.f32.mxu0 %vm275_vm1, %v246_v6  ;;  %1865 = vmatprep.mubr.msk.f32.mxu1 %vm275_vm1, %v246_v6  ;;  %v263_v23 = vld [vmem:[%s2233_s28 + $0xa8] sm:$0xff]  ;;  %v264_v24 = vld [vmem:[%s2233_s28 + $0xb0] sm:$0xff]  ;;  %v265_v25 = vld [vmem:[%s2233_s28 + $0xb8] sm:$0xff] }
  0x16   : > { %v266_v26 = vld [vmem:[%s2233_s28 + $0xc0] sm:$0xff]  ;;  %v267_v27 = vld [vmem:[%s2233_s28 + $0xc8] sm:$0xff]  ;;  %v268_v28 = vld [vmem:[%s2233_s28 + $0xd0] sm:$0xff] }
  0x17   : > { %v269_v29 = vld [vmem:[%s2233_s28 + $0xd8] sm:$0xff]  ;;  %v270_v30 = vld [vmem:[%s2233_s28 + $0xe0] sm:$0xff]  ;;  %v271_v31 = vld [vmem:[%s2233_s28 + $0xe8] sm:$0xff] }
  0x18   : > { %1816 = vmatmul.mubr.msk.f32.gmra.mxu0 %vm275_vm1, %v247_v7  ;;  %1866 = vmatmul.mubr.msk.f32.gmra.mxu1 %vm275_vm1, %v247_v7  ;;  %v272_v32 = vld [vmem:[%s2233_s28 + $0xf0] sm:$0xff]  ;;  %v273_v33 = vld [vmem:[%s2233_s28 + $0xf8] sm:$0xff] }
  0x19   : > { %1818 = vmatprep.mubr.msk.f32.mxu0 %vm275_vm1, %v248_v8  ;;  %1868 = vmatprep.mubr.msk.f32.mxu1 %vm275_vm1, %v248_v8 }
  0x1c   : > { %1819 = vmatmul.mubr.msk.f32.gmra.mxu0 %vm275_vm1, %v249_v9  ;;  %1869 = vmatmul.mubr.msk.f32.gmra.mxu1 %vm275_vm1, %v249_v9 }
  0x1d   : > { %1821 = vmatprep.mubr.msk.f32.mxu0 %vm275_vm1, %v250_v10  ;;  %1871 = vmatprep.mubr.msk.f32.mxu1 %vm275_vm1, %v250_v10 }
  0x20   : > { %1822 = vmatmul.mubr.msk.f32.gmra.mxu0 %vm275_vm1, %v251_v11  ;;  %1872 = vmatmul.mubr.msk.f32.gmra.mxu1 %vm275_vm1, %v251_v11 }
  0x21   : > { %1824 = vmatprep.mubr.msk.f32.mxu0 %vm275_vm1, %v252_v12  ;;  %1874 = vmatprep.mubr.msk.f32.mxu1 %vm275_vm1, %v252_v12 }
  0x24   : > { %1825 = vmatmul.mubr.msk.f32.gmra.mxu0 %vm275_vm1, %v253_v13  ;;  %1875 = vmatmul.mubr.msk.f32.gmra.mxu1 %vm275_vm1, %v253_v13 }
  0x25   : > { %1827 = vmatprep.mubr.msk.f32.mxu0 %vm275_vm1, %v254_v14  ;;  %1877 = vmatprep.mubr.msk.f32.mxu1 %vm275_vm1, %v254_v14 }
  0x28   : > { %1828 = vmatmul.mubr.msk.f32.gmra.mxu0 %vm275_vm1, %v255_v15  ;;  %1878 = vmatmul.mubr.msk.f32.gmra.mxu1 %vm275_vm1, %v255_v15 }
  0x29   : > { %1830 = vmatprep.mubr.msk.f32.mxu0 %vm275_vm1, %v256_v16  ;;  %1880 = vmatprep.mubr.msk.f32.mxu1 %vm275_vm1, %v256_v16 }
  0x2c   : > { %1831 = vmatmul.mubr.msk.f32.gmra.mxu0 %vm275_vm1, %v257_v17  ;;  %1881 = vmatmul.mubr.msk.f32.gmra.mxu1 %vm275_vm1, %v257_v17 }
  0x2d   : > { %1833 = vmatprep.mubr.msk.f32.mxu0 %vm275_vm1, %v258_v18  ;;  %1883 = vmatprep.mubr.msk.f32.mxu1 %vm275_vm1, %v258_v18 }
  0x30   : > { %1834 = vmatmul.mubr.msk.f32.gmra.mxu0 %vm275_vm1, %v259_v19  ;;  %1884 = vmatmul.mubr.msk.f32.gmra.mxu1 %vm275_vm1, %v259_v19 }
  0x31   : > { %1836 = vmatprep.mubr.msk.f32.mxu0 %vm275_vm1, %v260_v20  ;;  %1886 = vmatprep.mubr.msk.f32.mxu1 %vm275_vm1, %v260_v20 }
  0x34   : > { %1837 = vmatmul.mubr.msk.f32.gmra.mxu0 %vm275_vm1, %v261_v21  ;;  %1887 = vmatmul.mubr.msk.f32.gmra.mxu1 %vm275_vm1, %v261_v21 }
  0x35   : > { %1839 = vmatprep.mubr.msk.f32.mxu0 %vm275_vm1, %v262_v22  ;;  %1889 = vmatprep.mubr.msk.f32.mxu1 %vm275_vm1, %v262_v22 }
  0x38   : > { %1840 = vmatmul.mubr.msk.f32.gmra.mxu0 %vm275_vm1, %v263_v23  ;;  %1890 = vmatmul.mubr.msk.f32.gmra.mxu1 %vm275_vm1, %v263_v23 }
  0x39   : > { %1842 = vmatprep.mubr.msk.f32.mxu0 %vm275_vm1, %v264_v24  ;;  %1892 = vmatprep.mubr.msk.f32.mxu1 %vm275_vm1, %v264_v24 }
  0x3c   : > { %1843 = vmatmul.mubr.msk.f32.gmra.mxu0 %vm275_vm1, %v265_v25  ;;  %1893 = vmatmul.mubr.msk.f32.gmra.mxu1 %vm275_vm1, %v265_v25 }
  0x3d   : > { %1845 = vmatprep.mubr.msk.f32.mxu0 %vm275_vm1, %v266_v26  ;;  %1895 = vmatprep.mubr.msk.f32.mxu1 %vm275_vm1, %v266_v26 }
  0x40   : > { %1846 = vmatmul.mubr.msk.f32.gmra.mxu0 %vm275_vm1, %v267_v27  ;;  %1896 = vmatmul.mubr.msk.f32.gmra.mxu1 %vm275_vm1, %v267_v27 }
  0x41   : > { %1848 = vmatprep.mubr.msk.f32.mxu0 %vm275_vm1, %v268_v28  ;;  %1898 = vmatprep.mubr.msk.f32.mxu1 %vm275_vm1, %v268_v28 }
  0x44   : > { %1849 = vmatmul.mubr.msk.f32.gmra.mxu0 %vm275_vm1, %v269_v29  ;;  %1899 = vmatmul.mubr.msk.f32.gmra.mxu1 %vm275_vm1, %v269_v29 }
  0x45   : > { %1851 = vmatprep.mubr.msk.f32.mxu0 %vm275_vm1, %v270_v30  ;;  %1901 = vmatprep.mubr.msk.f32.mxu1 %vm275_vm1, %v270_v30 }
  0x48   : > { %1852 = vmatmul.mubr.msk.f32.gmra.mxu0 %vm275_vm1, %v271_v31  ;;  %1902 = vmatmul.mubr.msk.f32.gmra.mxu1 %vm275_vm1, %v271_v31 }
  0x49   : > { %1854 = vmatprep.mubr.msk.f32.mxu0 %vm275_vm1, %v272_v32  ;;  %1904 = vmatprep.mubr.msk.f32.mxu1 %vm275_vm1, %v272_v32 }
  0x4c   : > { %1855 = vmatmul.mubr.msk.f32.gmra.mxu0 %vm275_vm1, %v273_v33  ;;  %1905 = vmatmul.mubr.msk.f32.gmra.mxu1 %vm275_vm1, %v273_v33 }
  0xd0   : > { %v1811_v36 = vpop.f32.mrf.mxu0  ;;  %v1861_v38 = vpop.f32.mrf.mxu1 }
  0xd1   : > { %v609_v40 = vmul.f32 %v1811_v36, %v2334_v34  ;;  %v1174_v41 = vmul.f32 %v1861_v38, %v2339_v35 }
  0xd2   : > { %v442_v42 = vpop.f32.mrf.mxu0  ;;  %v1006_v43 = vpop.f32.mrf.mxu1 }
  0xd3   : > { %v2354_v44 = vadd.f32 %v2344_v37, %v609_v40  ;;  %v2357_v45 = vadd.f32 %v2349_v39, %v1174_v41  ;;  %v608_v46 = vmul.f32 %v2334_v34, %v442_v42  ;;  %v1173_v47 = vmul.f32 %v2339_v35, %v1006_v43 }
  0xd4   : > { %v1814_v48 = vpop.f32.mrf.mxu0  ;;  %v1864_v49 = vpop.f32.mrf.mxu1 }
  0xd5   : > { %v1638_v50 = vmul.f32 -1.442695, %v2354_v44  ;;  %v1708_v51 = vmul.f32 -1.442695, %v2357_v45  ;;  %v2364_v52 = vadd.f32 %v2344_v37, %v608_v46  ;;  %v2367_v53 = vadd.f32 %v2349_v39, %v1173_v47 }
  0xd6   : > { %v611_v54 = vmul.f32 %v1814_v48, %v2334_v34  ;;  %v1176_v55 = vmul.f32 %v1864_v49, %v2339_v35  ;;  %v452_v56 = vpop.f32.mrf.mxu0  ;;  %v1016_v57 = vpop.f32.mrf.mxu1 }
  0xd7   : > { %1915 = vpow2.f32 %v1638_v50  ;;  %v1637_v58 = vmul.f32 -1.442695, %v2364_v52  ;;  %v1707_v59 = vmul.f32 -1.442695, %v2367_v53  ;;  %v610_v60 = vmul.f32 %v2334_v34, %v452_v56 }
  0xd8   : > { %1917 = vpow2.f32 %v1708_v51  ;;  %v2375_v61 = vadd.f32 %v2344_v37, %v611_v54  ;;  %v2378_v62 = vadd.f32 %v2349_v39, %v1176_v55  ;;  %v1175_v63 = vmul.f32 %v2339_v35, %v1016_v57  ;;  %v1817_v0 = vpop.f32.mrf.mxu0  ;;  %v1867_v1 = vpop.f32.mrf.mxu1 }
  0xd9   : > { %1919 = vpow2.f32 %v1637_v58  ;;  %v2382_v2 = vadd.f32 %v2344_v37, %v610_v60  ;;  %v613_v3 = vmul.f32 %v1817_v0, %v2334_v34  ;;  %v1178_v4 = vmul.f32 %v1867_v1, %v2339_v35 }
  0xda   : > { %1921 = vpow2.f32 %v1707_v59  ;;  %v1640_v5 = vmul.f32 -1.442695, %v2375_v61  ;;  %v1710_v6 = vmul.f32 -1.442695, %v2378_v62  ;;  %v2389_v7 = vadd.f32 %v2349_v39, %v1175_v63  ;;  %v462_v8 = vpop.f32.mrf.mxu0  ;;  %v1026_v9 = vpop.f32.mrf.mxu1 }
  0xdb   : > { %v1639_v10 = vmul.f32 -1.442695, %v2382_v2  ;;  %v2393_v11 = vadd.f32 %v2344_v37, %v613_v3  ;;  %v2396_v12 = vadd.f32 %v2349_v39, %v1178_v4  ;;  %v612_v13 = vmul.f32 %v2334_v34, %v462_v8 }
  0xdc   : > { %1923 = vpow2.f32 %v1640_v5  ;;  %v1709_v14 = vmul.f32 -1.442695, %v2389_v7  ;;  %v1177_v15 = vmul.f32 %v2339_v35, %v1026_v9  ;;  %v1820_v16 = vpop.f32.mrf.mxu0  ;;  %v1870_v17 = vpop.f32.mrf.mxu1 }
  0xdd   : > { %1925 = vpow2.f32 %v1710_v6  ;;  %v1642_v18 = vmul.f32 -1.442695, %v2393_v11  ;;  %v1712_v19 = vmul.f32 -1.442695, %v2396_v12  ;;  %v2404_v20 = vadd.f32 %v2344_v37, %v612_v13 }
  0xde   : > { %1927 = vpow2.f32 %v1639_v10  ;;  %v2407_v21 = vadd.f32 %v2349_v39, %v1177_v15  ;;  %v615_v22 = vmul.f32 %v1820_v16, %v2334_v34  ;;  %v1180_v23 = vmul.f32 %v1870_v17, %v2339_v35  ;;  %v472_v24 = vpop.f32.mrf.mxu0  ;;  %v1036_v25 = vpop.f32.mrf.mxu1 }
  0xdf   : > { %1929 = vpow2.f32 %v1709_v14  ;;  %v1641_v26 = vmul.f32 -1.442695, %v2404_v20  ;;  %v614_v27 = vmul.f32 %v2334_v34, %v472_v24  ;;  %v1179_v28 = vmul.f32 %v2339_v35, %v1036_v25 }
  0xe0   : > { %1931 = vpow2.f32 %v1642_v18  ;;  %v1711_v29 = vmul.f32 -1.442695, %v2407_v21  ;;  %v2416_v30 = vadd.f32 %v2344_v37, %v615_v22  ;;  %v2419_v31 = vadd.f32 %v2349_v39, %v1180_v23  ;;  %v1823_v32 = vpop.f32.mrf.mxu0  ;;  %v1873_v33 = vpop.f32.mrf.mxu1 }
  0xe1   : > { %1933 = vpow2.f32 %v1712_v19  ;;  %v2422_v36 = vadd.f32 %v2344_v37, %v614_v27  ;;  %v2428_v46 = vadd.f32 %v2349_v39, %v1179_v28  ;;  %v617_v63 = vmul.f32 %v1823_v32, %v2334_v34 }
  0xe2   : > { %1935 = vpow2.f32 %v1641_v26  ;;  %v1644_v38 = vmul.f32 -1.442695, %v2416_v30  ;;  %v1714_v40 = vmul.f32 -1.442695, %v2419_v31  ;;  %v482_v41 = vpop.f32.mrf.mxu0  ;;  %v1046_v42 = vpop.f32.mrf.mxu1  ;;  %v1182_v1 = vmul.f32 %v1873_v33, %v2339_v35 }
  0xe3   : > { %1937 = vpow2.f32 %v1711_v29  ;;  %v1643_v43 = vmul.f32 -1.442695, %v2422_v36  ;;  %v1713_v58 = vmul.f32 -1.442695, %v2428_v46  ;;  %v616_v5 = vmul.f32 %v2334_v34, %v482_v41 }
  0xe4   : > { %v1916_v47 = vpop.eup %1915  ;;  %1939 = vpow2.f32 %v1644_v38  ;;  %v1826_v48 = vpop.f32.mrf.mxu0  ;;  %v1181_v10 = vmul.f32 %v2339_v35, %v1046_v42  ;;  %v2436_v16 = vadd.f32 %v2344_v37, %v617_v63  ;;  %v2440_v22 = vadd.f32 %v2349_v39, %v1182_v1 }
  0xe5   : > { %v1918_v49 = vpop.eup %1917  ;;  %v776_v50 = vadd.f32 1.0, %v1916_v47  ;;  %1941 = vpow2.f32 %v1714_v40  ;;  %v1876_v55 = vpop.f32.mrf.mxu1  ;;  %v619_v17 = vmul.f32 %v1826_v48, %v2334_v34  ;;  %v2444_v26 = vadd.f32 %v2344_v37, %v616_v5 }
  0xe6   : > { %v1920_v51 = vpop.eup %1919  ;;  %v1342_v54 = vadd.f32 1.0, %v1918_v49  ;;  %1943 = vpow2.f32 %v1643_v43  ;;  %v492_v59 = vpop.f32.mrf.mxu0  ;;  %v1184_v23 = vmul.f32 %v1876_v55, %v2339_v35  ;;  %v2447_v32 = vadd.f32 %v2349_v39, %v1181_v10 }
  0xe7   : > { %v1922_v56 = vpop.eup %1921  ;;  %1945 = vrcp.f32 %v776_v50  ;;  %v775_v57 = vadd.f32 1.0, %v1920_v51  ;;  %v1056_v6 = vpop.f32.mrf.mxu1  ;;  %v618_v33 = vmul.f32 %v2334_v34, %v492_v59  ;;  %v1646_v42 = vmul.f32 -1.442695, %v2436_v16 }
  0xe8   : > { %1947 = vrcp.f32 %v1342_v54  ;;  %v1341_v60 = vadd.f32 1.0, %v1922_v56  ;;  %v1829_v13 = vpop.f32.mrf.mxu0  ;;  %v2452_v43 = vadd.f32 %v2344_v37, %v619_v17  ;;  %v1716_v49 = vmul.f32 -1.442695, %v2440_v22 }
  0xe9   : > { %v1924_v0 = vpop.eup %1923  ;;  %1949 = vrcp.f32 %v775_v57  ;;  %v1879_v27 = vpop.f32.mrf.mxu1  ;;  %v2456_v50 = vadd.f32 %v2349_v39, %v1184_v23  ;;  %v1645_v55 = vmul.f32 -1.442695, %v2444_v26  ;;  %v1183_v56 = vmul.f32 %v2339_v35, %v1056_v6 }
  0xea   : > { %v1926_v3 = vpop.eup %1925  ;;  %1951 = vrcp.f32 %v1341_v60  ;;  %v778_v4 = vadd.f32 1.0, %v1924_v0  ;;  %v502_v38 = vpop.f32.mrf.mxu0  ;;  %v1715_v60 = vmul.f32 -1.442695, %v2447_v32  ;;  %v2462_v63 = vadd.f32 %v2344_v37, %v618_v33 }
  0xeb   : > { %v1928_v8 = vpop.eup %1927  ;;  %v1344_v9 = vadd.f32 1.0, %v1926_v3  ;;  %1953 = vpow2.f32 %v1713_v58  ;;  %v1066_v57 = vpop.f32.mrf.mxu1  ;;  %v621_v5 = vmul.f32 %v1829_v13, %v2334_v34  ;;  %v1186_v10 = vmul.f32 %v1879_v27, %v2339_v35 }
  0xec   : > { %v1930_v14 = vpop.eup %1929  ;;  %1955 = vrcp.f32 %v778_v4  ;;  %v777_v15 = vadd.f32 1.0, %v1928_v8  ;;  %v1832_v0 = vpop.f32.mrf.mxu0  ;;  %v1648_v4 = vmul.f32 -1.442695, %v2452_v43  ;;  %v2483_v13 = vadd.f32 %v2349_v39, %v1183_v56 }
  0xed   : > { %v1932_v18 = vpop.eup %1931  ;;  %1957 = vrcp.f32 %v1344_v9  ;;  %v1343_v19 = vadd.f32 1.0, %v1930_v14  ;;  %v1718_v9 = vmul.f32 -1.442695, %v2456_v50  ;;  %v1882_v17 = vpop.f32.mrf.mxu1  ;;  %v1647_v23 = vmul.f32 -1.442695, %v2462_v63 }
  0xee   : > { %v1934_v24 = vpop.eup %1933  ;;  %1959 = vrcp.f32 %v777_v15  ;;  %v780_v25 = vadd.f32 1.0, %v1932_v18 }
  0xef   : > { %v1936_v28 = vpop.eup %1935  ;;  %1961 = vrcp.f32 %v1343_v19  ;;  %v1346_v29 = vadd.f32 1.0, %v1934_v24  ;;  %v1185_v24 = vmul.f32 %v2339_v35, %v1066_v57 }
  0xf0   : > { %v1938_v40 = vpop.eup %1937  ;;  %1963 = vrcp.f32 %v780_v25  ;;  %v779_v41 = vadd.f32 1.0, %v1936_v28  ;;  %v2495_v28 = vadd.f32 %v2344_v37, %v621_v5 }
  0xf1   : > { %v1940_v47 = vpop.eup %1939  ;;  %1965 = vrcp.f32 %v1346_v29  ;;  %v1345_v48 = vadd.f32 1.0, %v1938_v40  ;;  %v623_v29 = vmul.f32 %v1832_v0, %v2334_v34  ;;  %v1188_v40 = vmul.f32 %v1882_v17, %v2339_v35 }
  0xf2   : > { %v1942_v51 = vpop.eup %1941  ;;  %1967 = vrcp.f32 %v779_v41  ;;  %v782_v54 = vadd.f32 1.0, %v1940_v47 }
  0xf3   : > { %v1944_v58 = vpop.eup %1943  ;;  %1969 = vrcp.f32 %v1345_v48  ;;  %v1348_v59 = vadd.f32 1.0, %v1942_v51  ;;  %v1076_v48 = vpop.f32.mrf.mxu1 }
  0xf4   : > { %v1946_v1 = vpop.eup %1945  ;;  %1971 = vrcp.f32 %v782_v54  ;;  %v781_v3 = vadd.f32 1.0, %v1944_v58  ;;  %v1717_v54 = vmul.f32 -1.442695, %v2483_v13  ;;  %v1650_v58 = vmul.f32 -1.442695, %v2495_v28 }
  0xf5   : > { %v1948_v6 = vpop.eup %1947  ;;  %v872_v8 = vmul.f32 %v1946_v1, %v2354_v44  ;;  %1973 = vrcp.f32 %v1348_v59  ;;  %v620_v44 = vmul.f32 %v2334_v34, %v502_v38  ;;  %v2501_v38 = vadd.f32 %v2349_v39, %v1186_v10 }
  0xf6   : > { %v1950_v14 = vpop.eup %1949  ;;  %v1438_v15 = vmul.f32 %v1948_v6, %v2357_v45  ;;  %1975 = vrcp.f32 %v781_v3  ;;  %v512_v45 = vpop.f32.mrf.mxu0  ;;  %v2530_v1 = vadd.f32 %v2349_v39, %v1188_v40  ;;  %v1187_v10 = vmul.f32 %v2339_v35, %v1076_v48 }
  0xf7   : > { %v1952_v18 = vpop.eup %1951  ;;  %904 = vst.msk [vmem:[%s2468_s14 + $0x8] sm:$0xff] %vm275_vm1, %v872_v8  ;;  %v871_v19 = vmul.f32 %v1950_v14, %v2364_v52  ;;  %1977 = vpow2.f32 %v1646_v42  ;;  %v2508_v42 = vadd.f32 %v2344_v37, %v620_v44  ;;  %v622_v47 = vmul.f32 %v2334_v34, %v512_v45 }
  0xf8   : > { %v1954_v25 = vpop.eup %1953  ;;  %1470 = vst.msk [vmem:[%s2477_s17 + $0x8] sm:$0xff] %vm275_vm1, %v1438_v15  ;;  %v1437_v27 = vmul.f32 %v1952_v18, %v2367_v53  ;;  %1979 = vpow2.f32 %v1716_v49  ;;  %v2516_v56 = vpop.f32.mrf.mxu0  ;;  %v1720_v0 = vmul.f32 -1.442695, %v2501_v38  ;;  %v1722_v18 = vmul.f32 -1.442695, %v2530_v1 }
  0xf9   : > { %v1956_v33 = vpop.eup %1955  ;;  %903 = vst.msk [vmem:[%s2468_s14] sm:$0xff] %vm275_vm1, %v871_v19  ;;  %v1347_v52 = vadd.f32 1.0, %v1954_v25  ;;  %1981 = vpow2.f32 %v1645_v55  ;;  %v2514_v55 = vadd.f32 %v2349_v39, %v1185_v24  ;;  %v2537_v5 = vadd.f32 %v2344_v37, %v622_v47 }
  0xfa   : > { %v1958_v41 = vpop.eup %1957  ;;  %1469 = vst.msk [vmem:[%s2477_s17] sm:$0xff] %vm275_vm1, %v1437_v27  ;;  %v874_v53 = vmul.f32 %v1956_v33, %v2375_v61  ;;  %1983 = vpow2.f32 %v1715_v60  ;;  %v2560_v25 = vadd.f32 %v2349_v39, %v1187_v10 }
  0xfb   : > { %v1960_v49 = vpop.eup %1959  ;;  %v1440_v51 = vmul.f32 %v1958_v41, %v2378_v62  ;;  %1985 = vrcp.f32 %v1347_v52  ;;  %v2523_v62 = vadd.f32 %v2344_v37, %v623_v29 }
  0xfc   : > { %v1962_v61 = vpop.eup %1961  ;;  %906 = vst.msk [vmem:[%s2468_s14 + $0x18] sm:$0xff] %vm275_vm1, %v874_v53  ;;  %v873_v57 = vmul.f32 %v1960_v49, %v2382_v2  ;;  %1987 = vpow2.f32 %v1648_v4  ;;  %v1649_v4 = vmul.f32 -1.442695, %v2508_v42  ;;  %v1721_v48 = vmul.f32 -1.442695, %v2560_v25 }
  0xfd   : > { %v1964_v59 = vpop.eup %1963  ;;  %1472 = vst.msk [vmem:[%s2477_s17 + $0x18] sm:$0xff] %vm275_vm1, %v1440_v51  ;;  %v1439_v60 = vmul.f32 %v1962_v61, %v2389_v7  ;;  %1989 = vpow2.f32 %v1718_v9  ;;  %v1885_v7 = vpop.f32.mrf.mxu1  ;;  %v1719_v9 = vmul.f32 -1.442695, %v2514_v55  ;;  %v1652_v44 = vmul.f32 -1.442695, %v2523_v62 }
  0xfe   : > { %v1966_v2 = vpop.eup %1965  ;;  %905 = vst.msk [vmem:[%s2468_s14 + $0x10] sm:$0xff] %vm275_vm1, %v873_v57  ;;  %v876_v3 = vmul.f32 %v1964_v59, %v2393_v11  ;;  %1991 = vpow2.f32 %v1647_v23  ;;  %v522_v11 = vpop.f32.mrf.mxu0 }
  0xff   : > { %v1968_v6 = vpop.eup %1967  ;;  %1471 = vst.msk [vmem:[%s2477_s17 + $0x10] sm:$0xff] %vm275_vm1, %v1439_v60  ;;  %v1442_v8 = vmul.f32 %v1966_v2, %v2396_v12  ;;  %1993 = vpow2.f32 %v1717_v54  ;;  %v1086_v24 = vpop.f32.mrf.mxu1  ;;  %v625_v54 = vmul.f32 %v2516_v56, %v2334_v34 }
 0x100   : > { %v1970_v14 = vpop.eup %1969  ;;  %908 = vst.msk [vmem:[%s2468_s14 + $0x28] sm:$0xff] %vm275_vm1, %v876_v3  ;;  %v875_v15 = vmul.f32 %v1968_v6, %v2404_v20  ;;  %1995 = vpow2.f32 %v1650_v58  ;;  %v1651_v20 = vmul.f32 -1.442695, %v2537_v5  ;;  %v1838_v27 = vpop.f32.mrf.mxu0  ;;  %v1190_v58 = vmul.f32 %v1885_v7, %v2339_v35 }
 0x101   : > { %v1972_v17 = vpop.eup %1971  ;;  %1474 = vst.msk [vmem:[%s2477_s17 + $0x28] sm:$0xff] %vm275_vm1, %v1442_v8  ;;  %v1441_v12 = vmul.f32 %v1970_v14, %v2407_v21  ;;  %1997 = vpow2.f32 %v1720_v0  ;;  %v1888_v41 = vpop.f32.mrf.mxu1  ;;  %v624_v0 = vmul.f32 %v2334_v34, %v522_v11  ;;  %v1189_v6 = vmul.f32 %v2339_v35, %v1086_v24 }
 0x102   : > { %v1974_v19 = vpop.eup %1973  ;;  %907 = vst.msk [vmem:[%s2468_s14 + $0x20] sm:$0xff] %vm275_vm1, %v875_v15  ;;  %v878_v23 = vmul.f32 %v1972_v17, %v2416_v30  ;;  %1999 = vpow2.f32 %v1649_v4  ;;  %v532_v49 = vpop.f32.mrf.mxu0  ;;  %v627_v7 = vmul.f32 %v1838_v27, %v2334_v34  ;;  %v2583_v14 = vadd.f32 %v2349_v39, %v1190_v58 }
 0x103   : > { %v1976_v45 = vpop.eup %1975  ;;  %1473 = vst.msk [vmem:[%s2477_s17 + $0x20] sm:$0xff] %vm275_vm1, %v1441_v12  ;;  %v1444_v21 = vmul.f32 %v1974_v19, %v2419_v31  ;;  %2001 = vpow2.f32 %v1719_v9  ;;  %v1096_v2 = vpop.f32.mrf.mxu1  ;;  %v2579_v9 = vadd.f32 %v2344_v37, %v625_v54  ;;  %v1192_v15 = vmul.f32 %v1888_v41, %v2339_v35 }
 0x104   : > { %v1978_v29 = vpop.eup %1977  ;;  %910 = vst.msk [vmem:[%s2468_s14 + $0x38] sm:$0xff] %vm275_vm1, %v878_v23  ;;  %v877_v30 = vmul.f32 %v1976_v45, %v2422_v36  ;;  %2003 = vpow2.f32 %v1652_v44  ;;  %v1841_v56 = vpop.f32.mrf.mxu0  ;;  %v2587_v12 = vadd.f32 %v2344_v37, %v624_v0  ;;  %v626_v24 = vmul.f32 %v2334_v34, %v532_v49 }
 0x105   : > { %v1980_v33 = vpop.eup %1979  ;;  %1476 = vst.msk [vmem:[%s2477_s17 + $0x38] sm:$0xff] %vm275_vm1, %v1444_v21  ;;  %v784_v52 = vadd.f32 1.0, %v1978_v29  ;;  %2005 = vpow2.f32 %v1722_v18  ;;  %v1891_v18 = vpop.f32.mrf.mxu1  ;;  %v1654_v29 = vmul.f32 -1.442695, %v2579_v9  ;;  %v629_v0 = vmul.f32 %v1841_v56, %v2334_v34 }
 0x106   : > { %v1982_v40 = vpop.eup %1981  ;;  %909 = vst.msk [vmem:[%s2468_s14 + $0x30] sm:$0xff] %vm275_vm1, %v877_v30  ;;  %v1350_v31 = vadd.f32 1.0, %v1980_v33  ;;  %2007 = vpow2.f32 %v1651_v20  ;;  %v2590_v20 = vadd.f32 %v2349_v39, %v1189_v6  ;;  %v542_v45 = vpop.f32.mrf.mxu0  ;;  %v2595_v30 = vadd.f32 %v2344_v37, %v627_v7 }
 0x107   : > { %v1984_v53 = vpop.eup %1983  ;;  %2009 = vrcp.f32 %v784_v52  ;;  %v783_v47 = vadd.f32 1.0, %v1982_v40  ;;  %v1724_v40 = vmul.f32 -1.442695, %v2583_v14  ;;  %v1106_v49 = vpop.f32.mrf.mxu1  ;;  %v1194_v6 = vmul.f32 %v1891_v18, %v2339_v35 }
 0x108   : > { %v1986_v36 = vpop.eup %1985  ;;  %2011 = vrcp.f32 %v1350_v31  ;;  %v1349_v51 = vadd.f32 1.0, %v1984_v53  ;;  %v2599_v31 = vadd.f32 %v2349_v39, %v1192_v15  ;;  %v1723_v54 = vmul.f32 -1.442695, %v2590_v20 }
 0x109   : > { %v1988_v61 = vpop.eup %1987  ;;  %v1443_v57 = vmul.f32 %v1986_v36, %v2428_v46  ;;  %2013 = vrcp.f32 %v783_v47  ;;  %v1653_v47 = vmul.f32 -1.442695, %v2587_v12  ;;  %v1894_v56 = vpop.f32.mrf.mxu1 }
 0x10a   : > { %v1990_v59 = vpop.eup %1989  ;;  %2015 = vrcp.f32 %v1349_v51  ;;  %v786_v60 = vadd.f32 1.0, %v1988_v61  ;;  %v2605_v61 = vadd.f32 %v2344_v37, %v626_v24 }
 0x10b   : > { %v1992_v3 = vpop.eup %1991  ;;  %1475 = vst.msk [vmem:[%s2477_s17 + $0x30] sm:$0xff] %vm275_vm1, %v1443_v57  ;;  %v1352_v4 = vadd.f32 1.0, %v1990_v59  ;;  %2017 = vpow2.f32 %v1721_v48  ;;  %v1191_v48 = vmul.f32 %v2339_v35, %v1096_v2  ;;  %v1844_v57 = vpop.f32.mrf.mxu0 }
 0x10c   : > { %v1994_v8 = vpop.eup %1993  ;;  %2019 = vrcp.f32 %v786_v60  ;;  %v785_v46 = vadd.f32 1.0, %v1992_v3  ;;  %v1656_v60 = vmul.f32 -1.442695, %v2595_v30  ;;  %v1655_v15 = vmul.f32 -1.442695, %v2605_v61 }
 0x10d   : > { %v1996_v10 = vpop.eup %1995  ;;  %2021 = vrcp.f32 %v1352_v4  ;;  %v1351_v11 = vadd.f32 1.0, %v1994_v8  ;;  %v1726_v4 = vmul.f32 -1.442695, %v2599_v31  ;;  %v2614_v7 = vadd.f32 %v2349_v39, %v1191_v48 }
 0x10e   : > { %v1998_v44 = vpop.eup %1997  ;;  %2023 = vrcp.f32 %v785_v46  ;;  %v788_v17 = vadd.f32 1.0, %v1996_v10  ;;  %v628_v10 = vmul.f32 %v2334_v34, %v542_v45  ;;  %v2632_v45 = vadd.f32 %v2349_v39, %v1194_v6 }
 0x10f   : > { %v2000_v19 = vpop.eup %1999  ;;  %2025 = vrcp.f32 %v1351_v11  ;;  %v1354_v23 = vadd.f32 1.0, %v1998_v44  ;;  %v1193_v44 = vmul.f32 %v2339_v35, %v1106_v49 }
 0x110   : > { %v2002_v21 = vpop.eup %2001  ;;  %2027 = vrcp.f32 %v788_v17  ;;  %v787_v27 = vadd.f32 1.0, %v2000_v19  ;;  %v2626_v19 = vadd.f32 %v2344_v37, %v629_v0 }
 0x111   : > { %v2004_v33 = vpop.eup %2003  ;;  %2029 = vrcp.f32 %v1354_v23  ;;  %v1353_v52 = vadd.f32 1.0, %v2002_v21  ;;  %v631_v23 = vmul.f32 %v1844_v57, %v2334_v34  ;;  %v1196_v21 = vmul.f32 %v1894_v56, %v2339_v35 }
 0x112   : > { %v2006_v41 = vpop.eup %2005  ;;  %2031 = vrcp.f32 %v787_v27  ;;  %v790_v53 = vadd.f32 1.0, %v2004_v33  ;;  %v1728_v57 = vmul.f32 -1.442695, %v2632_v45 }
 0x113   : > { %v2008_v36 = vpop.eup %2007  ;;  %2033 = vrcp.f32 %v1353_v52  ;;  %v1356_v51 = vadd.f32 1.0, %v2006_v41  ;;  %v1116_v52 = vpop.f32.mrf.mxu1 }
 0x114   : > { %v2010_v58 = vpop.eup %2009  ;;  %2035 = vrcp.f32 %v790_v53  ;;  %v789_v59 = vadd.f32 1.0, %v2008_v36  ;;  %v1725_v53 = vmul.f32 -1.442695, %v2614_v7  ;;  %v1658_v36 = vmul.f32 -1.442695, %v2626_v19 }
 0x115   : > { %v2012_v3 = vpop.eup %2011  ;;  %v880_v2 = vmul.f32 %v2010_v58, %v2436_v16  ;;  %2037 = vrcp.f32 %v1356_v51  ;;  %v2661_v58 = vadd.f32 %v2349_v39, %v1196_v21  ;;  %v1195_v6 = vmul.f32 %v2339_v35, %v1116_v52 }
 0x116   : > { %v2014_v8 = vpop.eup %2013  ;;  %v1446_v46 = vmul.f32 %v2012_v3, %v2440_v22  ;;  %2039 = vrcp.f32 %v789_v59  ;;  %v552_v22 = vpop.f32.mrf.mxu0 }
 0x117   : > { %v2016_v11 = vpop.eup %2015  ;;  %912 = vst.msk [vmem:[%s2468_s14 + $0x48] sm:$0xff] %vm275_vm1, %v880_v2  ;;  %v879_v16 = vmul.f32 %v2014_v8, %v2444_v26  ;;  %2041 = vpow2.f32 %v1654_v29  ;;  %v2639_v29 = vadd.f32 %v2344_v37, %v628_v10  ;;  %v630_v33 = vmul.f32 %v2334_v34, %v552_v22 }
 0x118   : > { %v2018_v17 = vpop.eup %2017  ;;  %1478 = vst.msk [vmem:[%s2477_s17 + $0x48] sm:$0xff] %vm275_vm1, %v1446_v46  ;;  %v1445_v18 = vmul.f32 %v2016_v11, %v2447_v32  ;;  %2043 = vpow2.f32 %v1724_v40  ;;  %v2647_v48 = vpop.f32.mrf.mxu0  ;;  %v1730_v11 = vmul.f32 -1.442695, %v2661_v58 }
 0x119   : > { %v2020_v24 = vpop.eup %2019  ;;  %911 = vst.msk [vmem:[%s2468_s14 + $0x40] sm:$0xff] %vm275_vm1, %v879_v16  ;;  %v1355_v26 = vadd.f32 1.0, %v2018_v17  ;;  %2045 = vpow2.f32 %v1653_v47  ;;  %v2645_v47 = vadd.f32 %v2349_v39, %v1193_v44  ;;  %v2668_v0 = vadd.f32 %v2344_v37, %v630_v33 }
 0x11a   : > { %v2022_v27 = vpop.eup %2021  ;;  %1477 = vst.msk [vmem:[%s2477_s17 + $0x40] sm:$0xff] %vm275_vm1, %v1445_v18  ;;  %v882_v32 = vmul.f32 %v2020_v24, %v2452_v43  ;;  %2047 = vpow2.f32 %v1723_v54  ;;  %v2691_v17 = vadd.f32 %v2349_v39, %v1195_v6 }
 0x11b   : > { %v2024_v40 = vpop.eup %2023  ;;  %v1448_v41 = vmul.f32 %v2022_v27, %v2456_v50  ;;  %2049 = vrcp.f32 %v1355_v26  ;;  %v2654_v50 = vadd.f32 %v2344_v37, %v631_v23 }
 0x11c   : > { %v2026_v43 = vpop.eup %2025  ;;  %914 = vst.msk [vmem:[%s2468_s14 + $0x58] sm:$0xff] %vm275_vm1, %v882_v32  ;;  %v881_v49 = vmul.f32 %v2024_v40, %v2462_v63  ;;  %2051 = vpow2.f32 %v1656_v60  ;;  %v1657_v60 = vmul.f32 -1.442695, %v2639_v29  ;;  %v1729_v52 = vmul.f32 -1.442695, %v2691_v17 }
 0x11d   : > { %v2028_v51 = vpop.eup %2027  ;;  %1480 = vst.msk [vmem:[%s2477_s17 + $0x58] sm:$0xff] %vm275_vm1, %v1448_v41  ;;  %v1447_v54 = vmul.f32 %v2026_v43, %v2483_v13  ;;  %2053 = vpow2.f32 %v1726_v4  ;;  %v1897_v13 = vpop.f32.mrf.mxu1  ;;  %v1727_v4 = vmul.f32 -1.442695, %v2645_v47  ;;  %v1660_v10 = vmul.f32 -1.442695, %v2654_v50 }
 0x11e   : > { %v2030_v63 = vpop.eup %2029  ;;  %913 = vst.msk [vmem:[%s2468_s14 + $0x50] sm:$0xff] %vm275_vm1, %v881_v49  ;;  %v884_v59 = vmul.f32 %v2028_v51, %v2495_v28  ;;  %2055 = vpow2.f32 %v1655_v15  ;;  %v562_v28 = vpop.f32.mrf.mxu0 }
 0x11f   : > { %v2032_v3 = vpop.eup %2031  ;;  %1479 = vst.msk [vmem:[%s2477_s17 + $0x50] sm:$0xff] %vm275_vm1, %v1447_v54  ;;  %v1450_v2 = vmul.f32 %v2030_v63, %v2501_v38  ;;  %2057 = vpow2.f32 %v1725_v53  ;;  %v1126_v44 = vpop.f32.mrf.mxu1  ;;  %v633_v53 = vmul.f32 %v2647_v48, %v2334_v34 }
 0x120   : > { %v2034_v8 = vpop.eup %2033  ;;  %916 = vst.msk [vmem:[%s2468_s14 + $0x68] sm:$0xff] %vm275_vm1, %v884_v59  ;;  %v883_v46 = vmul.f32 %v2032_v3, %v2508_v42  ;;  %2059 = vpow2.f32 %v1658_v36  ;;  %v1659_v42 = vmul.f32 -1.442695, %v2668_v0  ;;  %v1850_v18 = vpop.f32.mrf.mxu0  ;;  %v1198_v36 = vmul.f32 %v1897_v13, %v2339_v35 }
 0x121   : > { %v2036_v56 = vpop.eup %2035  ;;  %1482 = vst.msk [vmem:[%s2477_s17 + $0x68] sm:$0xff] %vm275_vm1, %v1450_v2  ;;  %v1449_v38 = vmul.f32 %v2034_v8, %v2514_v55  ;;  %2061 = vpow2.f32 %v1728_v57  ;;  %v1900_v27 = vpop.f32.mrf.mxu1  ;;  %v632_v57 = vmul.f32 %v2334_v34, %v562_v28  ;;  %v1197_v3 = vmul.f32 %v2339_v35, %v1126_v44 }
 0x122   : > { %v2038_v16 = vpop.eup %2037  ;;  %915 = vst.msk [vmem:[%s2468_s14 + $0x60] sm:$0xff] %vm275_vm1, %v883_v46  ;;  %v886_v15 = vmul.f32 %v2036_v56, %v2523_v62  ;;  %2063 = vpow2.f32 %v1657_v60  ;;  %v572_v40 = vpop.f32.mrf.mxu0  ;;  %v635_v13 = vmul.f32 %v1850_v18, %v2334_v34  ;;  %v2714_v8 = vadd.f32 %v2349_v39, %v1198_v36 }
 0x123   : > { %v2040_v22 = vpop.eup %2039  ;;  %1481 = vst.msk [vmem:[%s2477_s17 + $0x60] sm:$0xff] %vm275_vm1, %v1449_v38  ;;  %v1452_v55 = vmul.f32 %v2038_v16, %v2530_v1  ;;  %2065 = vpow2.f32 %v1727_v4  ;;  %v1136_v63 = vpop.f32.mrf.mxu1  ;;  %v2710_v4 = vadd.f32 %v2344_v37, %v633_v53  ;;  %v1200_v46 = vmul.f32 %v1900_v27, %v2339_v35 }
 0x124   : > { %v2042_v23 = vpop.eup %2041  ;;  %918 = vst.msk [vmem:[%s2468_s14 + $0x78] sm:$0xff] %vm275_vm1, %v886_v15  ;;  %v885_v62 = vmul.f32 %v2040_v22, %v2537_v5  ;;  %2067 = vpow2.f32 %v1660_v10  ;;  %v1853_v48 = vpop.f32.mrf.mxu0  ;;  %v2718_v38 = vadd.f32 %v2344_v37, %v632_v57  ;;  %v634_v44 = vmul.f32 %v2334_v34, %v572_v40 }
 0x125   : > { %v2044_v24 = vpop.eup %2043  ;;  %1484 = vst.msk [vmem:[%s2477_s17 + $0x78] sm:$0xff] %vm275_vm1, %v1452_v55  ;;  %v792_v26 = vadd.f32 1.0, %v2042_v23  ;;  %2069 = vpow2.f32 %v1730_v11  ;;  %v1903_v11 = vpop.f32.mrf.mxu1  ;;  %v1662_v23 = vmul.f32 -1.442695, %v2710_v4 }
 0x126   : > { %v2046_v21 = vpop.eup %2045  ;;  %917 = vst.msk [vmem:[%s2468_s14 + $0x70] sm:$0xff] %vm275_vm1, %v885_v62  ;;  %v1358_v1 = vadd.f32 1.0, %v2044_v24  ;;  %2071 = vpow2.f32 %v1659_v42  ;;  %v2721_v42 = vadd.f32 %v2349_v39, %v1197_v3  ;;  %v582_v22 = vpop.f32.mrf.mxu0  ;;  %v2726_v62 = vadd.f32 %v2344_v37, %v635_v13 }
 0x127   : > { %v2048_v32 = vpop.eup %2047  ;;  %2073 = vrcp.f32 %v792_v26  ;;  %v791_v33 = vadd.f32 1.0, %v2046_v21  ;;  %v1732_v21 = vmul.f32 -1.442695, %v2714_v8  ;;  %v2736_v53 = vadd.f32 %v2344_v37, %v634_v44  ;;  %v2747_v37 = vld [vmem:[%s2894_s2 + $0x1] ss:$0 sm:$0xff] }
 0x128   : > { %v2050_v5 = vpop.eup %2049  ;;  %2075 = vrcp.f32 %v1358_v1  ;;  %v1357_v41 = vadd.f32 1.0, %v2048_v32  ;;  %v2730_v1 = vadd.f32 %v2349_v39, %v1200_v46  ;;  %v1661_v32 = vmul.f32 -1.442695, %v2718_v38 }
 0x129   : > { %v2052_v43 = vpop.eup %2051  ;;  %v1451_v49 = vmul.f32 %v2050_v5, %v2560_v25  ;;  %2077 = vrcp.f32 %v791_v33  ;;  %v1199_v33 = vmul.f32 %v2339_v35, %v1136_v63  ;;  %v1664_v36 = vmul.f32 -1.442695, %v2726_v62 }
 0x12a   : > { %v2054_v51 = vpop.eup %2053  ;;  %2079 = vrcp.f32 %v1357_v41  ;;  %v794_v54 = vadd.f32 1.0, %v2052_v43  ;;  %v1731_v41 = vmul.f32 -1.442695, %v2721_v42  ;;  %v1856_v43 = vpop.f32.mrf.mxu0  ;;  %v1734_v63 = vmul.f32 -1.442695, %v2730_v1 }
 0x12b   : > { %v2056_v59 = vpop.eup %2055  ;;  %1483 = vst.msk [vmem:[%s2477_s17 + $0x70] sm:$0xff] %vm275_vm1, %v1451_v49  ;;  %v1360_v60 = vadd.f32 1.0, %v2054_v51  ;;  %2081 = vpow2.f32 %v1729_v52  ;;  %v1146_v52 = vpop.f32.mrf.mxu1  ;;  %v2171_v51 = vld [vmem:[%s2894_s2] ss:$0 sm:$0xff] }
 0x12c   : > { %v2058_v2 = vpop.eup %2057  ;;  %2083 = vrcp.f32 %v794_v54  ;;  %v793_v25 = vadd.f32 1.0, %v2056_v59  ;;  %v637_v35 = vmul.f32 %v2171_v51, %v1853_v48  ;;  %v1202_v59 = vmul.f32 %v2747_v37, %v1903_v11  ;;  %v2754_v48 = vld [vmem:[%s2895_s3 + $0x1] ss:$0 sm:$0xff]  ;;  %v592_v46 = vpop.f32.mrf.mxu0  ;;  %v2174_v11 = vld [vmem:[%s2895_s3] ss:$0 sm:$0xff] }
 0x12d   : > { %v2060_v6 = vpop.eup %2059  ;;  %2085 = vrcp.f32 %v1360_v60  ;;  %v1359_v28 = vadd.f32 1.0, %v2058_v2  ;;  %v636_v2 = vmul.f32 %v2171_v51, %v582_v22 }
 0x12e   : > { %v2062_v10 = vpop.eup %2061  ;;  %2087 = vrcp.f32 %v793_v25  ;;  %v796_v56 = vadd.f32 1.0, %v2060_v6  ;;  %v1906_v25 = vpop.f32.mrf.mxu1  ;;  %v2775_v22 = vadd.f32 %v2754_v48, %v1202_v59 }
 0x12f   : > { %v2064_v16 = vpop.eup %2063  ;;  %2089 = vrcp.f32 %v1359_v28  ;;  %v1362_v15 = vadd.f32 1.0, %v2062_v10  ;;  %v1201_v28 = vmul.f32 %v2747_v37, %v1146_v52 }
 0x130   : > { %v2066_v55 = vpop.eup %2065  ;;  %2091 = vrcp.f32 %v796_v56  ;;  %v795_v18 = vadd.f32 1.0, %v2064_v16  ;;  %v2770_v16 = vadd.f32 %v2174_v11, %v637_v35 }
 0x131   : > { %v2068_v24 = vpop.eup %2067  ;;  %2093 = vrcp.f32 %v1362_v15  ;;  %v1361_v26 = vadd.f32 1.0, %v2066_v55  ;;  %v1204_v55 = vmul.f32 %v2747_v37, %v1906_v25 }
 0x132   : > { %v2070_v27 = vpop.eup %2069  ;;  %2095 = vrcp.f32 %v795_v18  ;;  %v798_v34 = vadd.f32 1.0, %v2068_v24  ;;  %v638_v24 = vmul.f32 %v2171_v51, %v592_v46 }
 0x133   : > { %v2072_v40 = vpop.eup %2071  ;;  %2097 = vrcp.f32 %v1361_v26  ;;  %v1364_v5 = vadd.f32 1.0, %v2070_v27 }
 0x134   : > { %v2074_v49 = vpop.eup %2073  ;;  %2099 = vrcp.f32 %v798_v34  ;;  %v797_v39 = vadd.f32 1.0, %v2072_v40  ;;  %v2786_v34 = vadd.f32 %v2754_v48, %v1201_v28  ;;  %v1156_v40 = vpop.f32.mrf.mxu1 }
 0x135   : > { %v2076_v54 = vpop.eup %2075  ;;  %v888_v57 = vmul.f32 %v2074_v49, %v2579_v9  ;;  %2101 = vrcp.f32 %v1364_v5  ;;  %v2757_v9 = vadd.f32 %v2754_v48, %v1199_v33  ;;  %v1666_v33 = vmul.f32 -1.442695, %v2770_v16 }
 0x136   : > { %v2078_v60 = vpop.eup %2077  ;;  %v1454_v3 = vmul.f32 %v2076_v54, %v2583_v14  ;;  %2103 = vrcp.f32 %v797_v39  ;;  %v1663_v14 = vmul.f32 -1.442695, %v2736_v53  ;;  %v1735_v35 = vmul.f32 -1.442695, %v2786_v34 }
 0x137   : > { %v2080_v13 = vpop.eup %2079  ;;  %920 = vst.msk [vmem:[%s2468_s14 + $0x88] sm:$0xff] %vm275_vm1, %v888_v57  ;;  %v887_v6 = vmul.f32 %v2078_v60, %v2587_v12  ;;  %2105 = vpow2.f32 %v1662_v23  ;;  %v639_v12 = vmul.f32 %v2171_v51, %v1856_v43  ;;  %v2781_v23 = vadd.f32 %v2174_v11, %v636_v2 }
 0x138   : > { %v2082_v10 = vpop.eup %2081  ;;  %1486 = vst.msk [vmem:[%s2477_s17 + $0x88] sm:$0xff] %vm275_vm1, %v1454_v3  ;;  %v1453_v56 = vmul.f32 %v2080_v13, %v2590_v20  ;;  %2107 = vpow2.f32 %v1732_v21  ;;  %v1733_v27 = vmul.f32 -1.442695, %v2757_v9  ;;  %v2799_v43 = vadd.f32 %v2754_v48, %v1204_v55 }
 0x139   : > { %v2084_v15 = vpop.eup %2083  ;;  %919 = vst.msk [vmem:[%s2468_s14 + $0x80] sm:$0xff] %vm275_vm1, %v887_v6  ;;  %v1363_v44 = vadd.f32 1.0, %v2082_v10  ;;  %2109 = vpow2.f32 %v1661_v32  ;;  %v2792_v52 = vadd.f32 %v2174_v11, %v639_v12  ;;  %v1665_v39 = vmul.f32 -1.442695, %v2781_v23 }
 0x13a   : > { %v2086_v20 = vpop.eup %2085  ;;  %1485 = vst.msk [vmem:[%s2477_s17 + $0x80] sm:$0xff] %vm275_vm1, %v1453_v56  ;;  %v890_v18 = vmul.f32 %v2084_v15, %v2595_v30  ;;  %2111 = vpow2.f32 %v1731_v41  ;;  %v1736_v41 = vmul.f32 -1.442695, %v2775_v22  ;;  %v1203_v54 = vmul.f32 %v2747_v37, %v1156_v40 }
 0x13b   : > { %v2088_v26 = vpop.eup %2087  ;;  %v1456_v21 = vmul.f32 %v2086_v20, %v2599_v31  ;;  %2113 = vrcp.f32 %v1363_v44  ;;  %v1738_v60 = vmul.f32 -1.442695, %v2799_v43 }
 0x13c   : > { %v2090_v32 = vpop.eup %2089  ;;  %922 = vst.msk [vmem:[%s2468_s14 + $0x98] sm:$0xff] %vm275_vm1, %v890_v18  ;;  %v889_v30 = vmul.f32 %v2088_v26, %v2605_v61  ;;  %2115 = vpow2.f32 %v1664_v36  ;;  %v2805_v36 = vadd.f32 %v2174_v11, %v638_v24 }
 0x13d   : > { %v2092_v31 = vpop.eup %2091  ;;  %1488 = vst.msk [vmem:[%s2477_s17 + $0x98] sm:$0xff] %vm275_vm1, %v1456_v21  ;;  %v1455_v5 = vmul.f32 %v2090_v32, %v2614_v7  ;;  %2117 = vpow2.f32 %v1734_v63  ;;  %v1668_v63 = vmul.f32 -1.442695, %v2792_v52 }
 0x13e   : > { %v2094_v61 = vpop.eup %2093  ;;  %921 = vst.msk [vmem:[%s2468_s14 + $0x90] sm:$0xff] %vm275_vm1, %v889_v30  ;;  %v892_v49 = vmul.f32 %v2092_v31, %v2626_v19  ;;  %2119 = vpow2.f32 %v1663_v14 }
 0x13f   : > { %v2096_v51 = vpop.eup %2095  ;;  %1487 = vst.msk [vmem:[%s2477_s17 + $0x90] sm:$0xff] %vm275_vm1, %v1455_v5  ;;  %v1458_v7 = vmul.f32 %v2094_v61, %v2632_v45  ;;  %2121 = vpow2.f32 %v1733_v27 }
 0x140   : > { %v2098_v57 = vpop.eup %2097  ;;  %924 = vst.msk [vmem:[%s2468_s14 + $0xa8] sm:$0xff] %vm275_vm1, %v892_v49  ;;  %v891_v19 = vmul.f32 %v2096_v51, %v2639_v29  ;;  %2123 = vpow2.f32 %v1666_v33  ;;  %v1667_v29 = vmul.f32 -1.442695, %v2805_v36 }
 0x141   : > { %v2100_v59 = vpop.eup %2099  ;;  %1490 = vst.msk [vmem:[%s2477_s17 + $0xa8] sm:$0xff] %vm275_vm1, %v1458_v7  ;;  %v1457_v45 = vmul.f32 %v2098_v57, %v2645_v47  ;;  %2125 = vpow2.f32 %v1736_v41  ;;  %v2828_v47 = vadd.f32 %v2754_v48, %v1203_v54 }
 0x142   : > { %v2102_v37 = vpop.eup %2101  ;;  %923 = vst.msk [vmem:[%s2468_s14 + $0xa0] sm:$0xff] %vm275_vm1, %v891_v19  ;;  %v894_v3 = vmul.f32 %v2100_v59, %v2654_v50  ;;  %2127 = vpow2.f32 %v1665_v39 }
 0x143   : > { %v2104_v2 = vpop.eup %2103  ;;  %1489 = vst.msk [vmem:[%s2477_s17 + $0xa0] sm:$0xff] %vm275_vm1, %v1457_v45  ;;  %v1460_v25 = vmul.f32 %v2102_v37, %v2661_v58  ;;  %2129 = vpow2.f32 %v1735_v35  ;;  %v1737_v10 = vmul.f32 -1.442695, %v2828_v47 }
 0x144   : > { %v2106_v13 = vpop.eup %2105  ;;  %926 = vst.msk [vmem:[%s2468_s14 + $0xb8] sm:$0xff] %vm275_vm1, %v894_v3  ;;  %v893_v6 = vmul.f32 %v2104_v2, %v2668_v0  ;;  %2131 = vpow2.f32 %v1668_v63 }
 0x145   : > { %v2108_v50 = vpop.eup %2107  ;;  %1492 = vst.msk [vmem:[%s2477_s17 + $0xb8] sm:$0xff] %vm275_vm1, %v1460_v25  ;;  %v800_v14 = vadd.f32 1.0, %v2106_v13  ;;  %2133 = vpow2.f32 %v1738_v60 }
 0x146   : > { %v2110_v28 = vpop.eup %2109  ;;  %925 = vst.msk [vmem:[%s2468_s14 + $0xb0] sm:$0xff] %vm275_vm1, %v893_v6  ;;  %v1366_v46 = vadd.f32 1.0, %v2108_v50  ;;  %2135 = vpow2.f32 %v1667_v29 }
 0x147   : > { %v2112_v58 = vpop.eup %2111  ;;  %2137 = vrcp.f32 %v800_v14  ;;  %v799_v48 = vadd.f32 1.0, %v2110_v28 }
 0x148   : > { %v2114_v56 = vpop.eup %2113  ;;  %2139 = vrcp.f32 %v1366_v46  ;;  %v1365_v0 = vadd.f32 1.0, %v2112_v58 }
 0x149   : > { %v2116_v11 = vpop.eup %2115  ;;  %v1459_v12 = vmul.f32 %v2114_v56, %v2691_v17  ;;  %2141 = vrcp.f32 %v799_v48 }
 0x14a   : > { %v2118_v15 = vpop.eup %2117  ;;  %2143 = vrcp.f32 %v1365_v0  ;;  %v802_v44 = vadd.f32 1.0, %v2116_v11 }
 0x14b   : > { %v2120_v55 = vpop.eup %2119  ;;  %1491 = vst.msk [vmem:[%s2477_s17 + $0xb0] sm:$0xff] %vm275_vm1, %v1459_v12  ;;  %v1368_v20 = vadd.f32 1.0, %v2118_v15  ;;  %2145 = vpow2.f32 %v1737_v10 }
 0x14c   : > { %v2122_v18 = vpop.eup %2121  ;;  %2147 = vrcp.f32 %v802_v44  ;;  %v801_v24 = vadd.f32 1.0, %v2120_v55 }
 0x14d   : > { %v2124_v26 = vpop.eup %2123  ;;  %2149 = vrcp.f32 %v1368_v20  ;;  %v1367_v21 = vadd.f32 1.0, %v2122_v18 }
 0x14e   : > { %v2126_v27 = vpop.eup %2125  ;;  %2151 = vrcp.f32 %v801_v24  ;;  %v804_v32 = vadd.f32 1.0, %v2124_v26 }
 0x14f   : > { %v2128_v30 = vpop.eup %2127  ;;  %2153 = vrcp.f32 %v1367_v21  ;;  %v1370_v17 = vadd.f32 1.0, %v2126_v27 }
 0x150   : > { %v2130_v33 = vpop.eup %2129  ;;  %2155 = vrcp.f32 %v804_v32  ;;  %v803_v40 = vadd.f32 1.0, %v2128_v30 }
 0x151   : > { %v2132_v31 = vpop.eup %2131  ;;  %2157 = vrcp.f32 %v1370_v17  ;;  %v1369_v5 = vadd.f32 1.0, %v2130_v33 }
 0x152   : > { %v2134_v41 = vpop.eup %2133  ;;  %2159 = vrcp.f32 %v803_v40  ;;  %v806_v61 = vadd.f32 1.0, %v2132_v31 }
 0x153   : > { %v2136_v49 = vpop.eup %2135  ;;  %2161 = vrcp.f32 %v1369_v5  ;;  %v1372_v39 = vadd.f32 1.0, %v2134_v41 }
 0x154   : > { %v2138_v51 = vpop.eup %2137  ;;  %2163 = vrcp.f32 %v806_v61  ;;  %v805_v7 = vadd.f32 1.0, %v2136_v49 }
 0x155   : > { %v2140_v35 = vpop.eup %2139  ;;  %v896_v54 = vmul.f32 %v2138_v51, %v2710_v4  ;;  %2165 = vrcp.f32 %v1372_v39 }
 0x156   : > { %v2142_v57 = vpop.eup %2141  ;;  %v1462_v19 = vmul.f32 %v2140_v35, %v2714_v8  ;;  %2167 = vrcp.f32 %v805_v7 }
 0x157   : > { %v2144_v63 = vpop.eup %2143  ;;  %928 = vst.msk [vmem:[%s2468_s14 + $0xc8] sm:$0xff] %vm275_vm1, %v896_v54  ;;  %v895_v59 = vmul.f32 %v2142_v57, %v2718_v38 }
 0x158   : > { %v2146_v45 = vpop.eup %2145  ;;  %1494 = vst.msk [vmem:[%s2477_s17 + $0xc8] sm:$0xff] %vm275_vm1, %v1462_v19  ;;  %v1461_v60 = vmul.f32 %v2144_v63, %v2721_v42 }
 0x159   : > { %v2148_v37 = vpop.eup %2147  ;;  %927 = vst.msk [vmem:[%s2468_s14 + $0xc0] sm:$0xff] %vm275_vm1, %v895_v59  ;;  %v1371_v4 = vadd.f32 1.0, %v2146_v45 }
 0x15a   : > { %v2150_v3 = vpop.eup %2149  ;;  %1493 = vst.msk [vmem:[%s2477_s17 + $0xc0] sm:$0xff] %vm275_vm1, %v1461_v60  ;;  %v898_v8 = vmul.f32 %v2148_v37, %v2726_v62 }
 0x15b   : > { %v2152_v29 = vpop.eup %2151  ;;  %v1464_v38 = vmul.f32 %v2150_v3, %v2730_v1  ;;  %2169 = vrcp.f32 %v1371_v4 }
 0x15c   : > { %v2154_v2 = vpop.eup %2153  ;;  %930 = vst.msk [vmem:[%s2468_s14 + $0xd8] sm:$0xff] %vm275_vm1, %v898_v8  ;;  %v897_v42 = vmul.f32 %v2152_v29, %v2736_v53 }
 0x15d   : > { %v2156_v25 = vpop.eup %2155  ;;  %1496 = vst.msk [vmem:[%s2477_s17 + $0xd8] sm:$0xff] %vm275_vm1, %v1464_v38  ;;  %v1463_v13 = vmul.f32 %v2154_v2, %v2757_v9 }
 0x15e   : > { %v2158_v6 = vpop.eup %2157  ;;  %929 = vst.msk [vmem:[%s2468_s14 + $0xd0] sm:$0xff] %vm275_vm1, %v897_v42  ;;  %v900_v62 = vmul.f32 %v2156_v25, %v2770_v16 }
 0x15f   : > { %v2160_v1 = vpop.eup %2159  ;;  %1495 = vst.msk [vmem:[%s2477_s17 + $0xd0] sm:$0xff] %vm275_vm1, %v1463_v13  ;;  %v1466_v50 = vmul.f32 %v2158_v6, %v2775_v22 }
 0x160   : > { %v2162_v53 = vpop.eup %2161  ;;  %932 = vst.msk [vmem:[%s2468_s14 + $0xe8] sm:$0xff] %vm275_vm1, %v900_v62  ;;  %v899_v14 = vmul.f32 %v2160_v1, %v2781_v23 }
 0x161   : > { %v2164_v9 = vpop.eup %2163  ;;  %1498 = vst.msk [vmem:[%s2477_s17 + $0xe8] sm:$0xff] %vm275_vm1, %v1466_v50  ;;  %v1465_v28 = vmul.f32 %v2162_v53, %v2786_v34 }
 0x162   : > { %v2166_v16 = vpop.eup %2165  ;;  %931 = vst.msk [vmem:[%s2468_s14 + $0xe0] sm:$0xff] %vm275_vm1, %v899_v14  ;;  %v902_v46 = vmul.f32 %v2164_v9, %v2792_v52 }
 0x163   : > { %v2168_v58 = vpop.eup %2167  ;;  %1497 = vst.msk [vmem:[%s2477_s17 + $0xe0] sm:$0xff] %vm275_vm1, %v1465_v28  ;;  %v1468_v22 = vmul.f32 %v2166_v16, %v2799_v43 }
 0x164   : > { %934 = vst.msk [vmem:[%s2468_s14 + $0xf8] sm:$0xff] %vm275_vm1, %v902_v46  ;;  %v901_v23 = vmul.f32 %v2168_v58, %v2805_v36 }
 0x165   : > { %1500 = vst.msk [vmem:[%s2477_s17 + $0xf8] sm:$0xff] %vm275_vm1, %v1468_v22 }
 0x166   : > { %933 = vst.msk [vmem:[%s2468_s14 + $0xf0] sm:$0xff] %vm275_vm1, %v901_v23 }
 0x168   : > { %v2170_v48 = vpop.eup %2169 }
 0x169   : > { %v1467_v34 = vmul.f32 %v2170_v48, %v2828_v47 }
 0x16b   : > { %1499 = vst.msk [vmem:[%s2477_s17 + $0xf0] sm:$0xff] %vm275_vm1, %v1467_v34 }
 0x16c PF: > { %s16_s18 = sadd.s32 1, %s2181_s18  }
 0x16d   : > { %p13_p4 = scmp.ge.s32.totalorder %s16_s18, 4  }
 0x16f   :  { %15 = sbr.rel (!%p13_p4) target bundleno = 1 (0x1), region = 81 }

</bundles_post_ra>
